<compile_context>
chip_gen: v6e
topology: v6e:2x2x1
jax: 0.10.0
libtpu: 0.0.40
codegen_flags: <defaults>
</compile_context>

<pallas_src>
import jax
import jax.numpy as jnp
from jax import lax
from jax.experimental import pallas as pl
from jax.experimental.pallas import tpu as pltpu


def _make_kernel(Cin, KH, KW, TH, Wp):
    """Build the conv+bias+ReLU kernel for fixed static geometry."""
    TR = TH * Wp  # lane-dense pixel axis per strip (on the padded width)

    def kernel(x_ref, w_ref, b_ref, o_ref, panel_ref):
        # x_ref:     (1, Cin, (TH+KH-1)*Wp + KW-1) bf16 -- one padded input
        #            row-strip, pixel axis flattened row-major (rows of Wp),
        #            plus a KW-1 zero tail so every tap slice is in-bounds.
        # w_ref:     (Cout, K) bf16, K ordered (kh, kw, cin) -- resident.
        # b_ref:     (Cout, 1) f32 -- resident.
        # o_ref:     (1, Cout, TH*Wp) bf16 -- lane-dense output strip (still on
        #            the padded width; wrapper slices off the junk columns).
        # panel_ref: (K, TH*Wp) bf16 VMEM scratch -- in-kernel im2col panel.
        for kh in range(KH):                      # static, unrolled at trace time
            for kw in range(KW):
                t = kh * KW + kw
                off = kh * Wp + kw                # static lane offset of this tap
                panel_ref[t * Cin:(t + 1) * Cin, :] = x_ref[0, :, off:off + TR]
        acc = jnp.dot(w_ref[...], panel_ref[...],
                      preferred_element_type=jnp.float32)   # single MXU matmul
        acc = jnp.maximum(acc + b_ref[...], 0.0)             # fused bias + ReLU
        o_ref[...] = acc[None].astype(o_ref.dtype)           # dense bf16 store

    return kernel


def _pick_row_tile(H_out, Wp, Cin, Cout, K, *, budget_bytes=12 << 20):
    """Output-rows-per-strip such that every live VMEM buffer fits in a
    conservative budget (safe under v5e's 16 MiB default scoped VMEM and
    v7x's 64 MiB physical VMEM), while keeping tiles big enough to amortize
    the ~0.35 us per-grid-step overhead."""
    bytes_per_row = (
        2 * Cin * Wp * 2        # input strip rows (bf16), double-buffered
        + K * Wp * 2            # im2col panel scratch (bf16)
        + Cout * Wp * 4         # f32 accumulator
        + 2 * Cout * Wp * 2)    # output strip rows (bf16), double-buffered
    th = int(budget_bytes // max(bytes_per_row, 1))
    return max(1, min(th, H_out))


def conv_module_forward(x_nchw, weight_oihw, bias, *,
                        stride=1, padding=1, dilation=1, groups=1,
                        out_dtype=jnp.bfloat16):
    """ReLU(Conv2d(x, weight, bias)) -- the default ConvModule forward path."""
    if stride != 1 or dilation != 1 or groups != 1:
        # TODO(synk): stride!=1 / dilation!=1 / groups!=1 conv variants.
        raise NotImplementedError("only stride=1, dilation=1, groups=1 supported")

    N, Cin, H, W = x_nchw.shape
    Cout, Cin_w, KH, KW = weight_oihw.shape
    assert Cin == Cin_w
    H_out = H + 2 * padding - KH + 1
    W_out = W + 2 * padding - KW + 1
    Wp = W + 2 * padding
    K = Cin * KH * KW

    # ---- row-strip tiling (VMEM-budget-driven) -----------------------------
    TH = _pick_row_tile(H_out, Wp, Cin, Cout, K)
    S = pl.cdiv(H_out, TH)            # strips per image
    H_pad = S * TH                    # ragged H_out -> extra junk rows, sliced off
    THp = TH + KH - 1                 # padded-input rows needed per strip (halo)
    TR = TH * Wp                      # pixels per strip (padded width)

    # ---- plain-XLA glue: bf16 cast, pad, overlapping row strips ------------
    xb = x_nchw.astype(jnp.bfloat16)                         # cast BEFORE pad
    xp = jnp.pad(xb, ((0, 0), (0, 0),
                      (padding, padding + (H_pad - H_out)),  # extra junk rows
                      (padding, padding)))
    if S == 1:
        strips = xp[:, None]                                 # (N, 1, Cin, THp, Wp)
    else:                                                    # (KH-1)-row halo only
        strips = jnp.stack(
            [xp[:, :, s * TH:s * TH + THp, :] for s in range(S)], axis=1)
    xs = strips.reshape(N * S, Cin, THp * Wp)
    xs = jnp.pad(xs, ((0, 0), (0, 0), (0, KW - 1)))          # keep tap slices in-bounds
    L_in = THp * Wp + KW - 1

    # K ordered (kh, kw, cin) to match the in-kernel panel layout.
    w2 = weight_oihw.transpose(0, 2, 3, 1).reshape(Cout, K).astype(jnp.bfloat16)
    b2 = bias.reshape(Cout, 1).astype(jnp.float32)

    kernel = _make_kernel(Cin, KH, KW, TH, Wp)
    grid = (N * S,)                   # flat 1-D parallel grid (feeds both v7x TCs)

    out_flat = pl.pallas_call(
        kernel,
        out_shape=jax.ShapeDtypeStruct((N * S, Cout, TR), out_dtype),
        grid_spec=pltpu.PrefetchScalarGridSpec(
            num_scalar_prefetch=0,
            grid=grid,
            in_specs=[
                pl.BlockSpec((1, Cin, L_in), lambda i: (i, 0, 0)),
                pl.BlockSpec((Cout, K), lambda i: (0, 0)),   # weight stays resident
                pl.BlockSpec((Cout, 1), lambda i: (0, 0)),   # bias stays resident
            ],
            out_specs=pl.BlockSpec((1, Cout, TR), lambda i: (i, 0, 0)),
            scratch_shapes=[pltpu.VMEM((K, TR), jnp.bfloat16)],
        ),
        compiler_params=pltpu.CompilerParams(
            dimension_semantics=("parallel",)),
    )(xs, w2, b2)

    # (N*S, Cout, TH*Wp) -> (N, Cout, H_out, W_out): drop junk rows / columns.
    out = out_flat.reshape(N, S, Cout, TH, Wp).transpose(0, 2, 1, 3, 4)
    out = out.reshape(N, Cout, H_pad, Wp)[:, :, :H_out, :W_out]
    return out


def _reference(x_nchw, weight_oihw, bias, *, padding=1):
    out = lax.conv_general_dilated(
        x_nchw, weight_oihw,
        window_strides=(1, 1),
        padding=[(padding, padding), (padding, padding)],
        dimension_numbers=("NCHW", "OIHW", "NCHW"),
        precision=lax.Precision.HIGHEST)
    out = out + bias.reshape(1, -1, 1, 1)
    return jnp.maximum(out, 0.0)


if __name__ == "__main__":
    # ConvModule(in_channels=4, out_channels=8, kernel_size=3, padding=1)
    N, Cin, H, W = 2, 4, 16, 16
    Cout, KH, KW = 8, 3, 3
    padding = 1

    key = jax.random.PRNGKey(0)
    kx, kw_, kb = jax.random.split(key, 3)
    x = jax.random.normal(kx, (N, Cin, H, W), dtype=jnp.float32)
    weight = jax.random.normal(kw_, (Cout, Cin, KH, KW), dtype=jnp.float32) * 0.1
    bias = jax.random.normal(kb, (Cout,), dtype=jnp.float32) * 0.1

    out = conv_module_forward(x, weight, bias, padding=padding)
    out = jax.block_until_ready(out)

    # Kernel feeds the MXU bf16 operands with f32 accumulation and stores the
    # result in bf16, so compare against an f32 reference on the same
    # bf16-rounded inputs with a bf16-output-sized tolerance.
    x_r = x.astype(jnp.bfloat16).astype(jnp.float32)
    w_r = weight.astype(jnp.bfloat16).astype(jnp.float32)
    ref = _reference(x_r, w_r, bias, padding=padding)

    assert out.shape == (N, Cout, H, W), out.shape
    err = float(jnp.max(jnp.abs(out.astype(jnp.float32) - ref)))
    assert jnp.allclose(out.astype(jnp.float32), ref, atol=3e-2, rtol=3e-2), (
        "mismatch vs reference, max abs err = %f" % err)

    print("KERNEL_OK")
</pallas_src>

<mosaic_0001>
module attributes {stable_mosaic.version = 11 : i64} {
  func.func @kernel(%arg0: i32, %arg1: memref<1x4x326xbf16, #tpu.memory_space<vmem>>, %arg2: memref<8x36xbf16, #tpu.memory_space<vmem>>, %arg3: memref<8x1xf32, #tpu.memory_space<vmem>>, %arg4: memref<1x8x288xbf16, #tpu.memory_space<vmem>>, %arg5: memref<36x288xbf16, #tpu.memory_space<vmem>>) attributes {dimension_semantics = [#tpu.dimension_semantics<parallel>], iteration_bounds = array<i64: 2>, scalar_prefetch = 0 : i64, scratch_operands = 1 : i64, tpu.core_type = #tpu.core_type<tc>, window_params = [{transform_indices = @transform_0, window_bounds = array<i64: 1, 4, 326>}, {pipeline_mode = #tpu.pipeline_mode<synchronous>, transform_indices = @transform_1, window_bounds = array<i64: 8, 36>}, {pipeline_mode = #tpu.pipeline_mode<synchronous>, transform_indices = @transform_2, window_bounds = array<i64: 8, 1>}, {transform_indices = @transform_3, window_bounds = array<i64: 1, 8, 288>}]} {
    %c0 = arith.constant 0 : index
    %c0_0 = arith.constant 0 : index
    %c0_1 = arith.constant 0 : index
    %0 = vector.load %arg1[%c0, %c0_0, %c0_1] : memref<1x4x326xbf16, #tpu.memory_space<vmem>>, vector<1x4x288xbf16>
    %1 = vector.shape_cast %0 : vector<1x4x288xbf16> to vector<4x288xbf16>
    %c0_2 = arith.constant 0 : index
    %c0_3 = arith.constant 0 : index
    %2 = vector.load %arg5[%c0_2, %c0_3] : memref<36x288xbf16, #tpu.memory_space<vmem>>, vector<4x288xbf16>
    tpu.vector_store %arg5[%c0_2, %c0_3], %1 {strides = array<i32>} : memref<36x288xbf16, #tpu.memory_space<vmem>>, vector<4x288xbf16>,
    %c0_4 = arith.constant 0 : index
    %c0_5 = arith.constant 0 : index
    %c1 = arith.constant 1 : index
    %3 = vector.load %arg1[%c0_4, %c0_5, %c1] : memref<1x4x326xbf16, #tpu.memory_space<vmem>>, vector<1x4x288xbf16>
    %4 = vector.shape_cast %3 : vector<1x4x288xbf16> to vector<4x288xbf16>
    %c4 = arith.constant 4 : index
    %c0_6 = arith.constant 0 : index
    %5 = vector.load %arg5[%c4, %c0_6] : memref<36x288xbf16, #tpu.memory_space<vmem>>, vector<4x288xbf16>
    tpu.vector_store %arg5[%c4, %c0_6], %4 {strides = array<i32>} : memref<36x288xbf16, #tpu.memory_space<vmem>>, vector<4x288xbf16>,
    %c0_7 = arith.constant 0 : index
    %c0_8 = arith.constant 0 : index
    %c2 = arith.constant 2 : index
    %6 = vector.load %arg1[%c0_7, %c0_8, %c2] : memref<1x4x326xbf16, #tpu.memory_space<vmem>>, vector<1x4x288xbf16>
    %7 = vector.shape_cast %6 : vector<1x4x288xbf16> to vector<4x288xbf16>
    %c8 = arith.constant 8 : index
    %c0_9 = arith.constant 0 : index
    %8 = vector.load %arg5[%c8, %c0_9] : memref<36x288xbf16, #tpu.memory_space<vmem>>, vector<4x288xbf16>
    tpu.vector_store %arg5[%c8, %c0_9], %7 {strides = array<i32>} : memref<36x288xbf16, #tpu.memory_space<vmem>>, vector<4x288xbf16>,
    %c0_10 = arith.constant 0 : index
    %c0_11 = arith.constant 0 : index
    %c18 = arith.constant 18 : index
    %9 = vector.load %arg1[%c0_10, %c0_11, %c18] : memref<1x4x326xbf16, #tpu.memory_space<vmem>>, vector<1x4x288xbf16>
    %10 = vector.shape_cast %9 : vector<1x4x288xbf16> to vector<4x288xbf16>
    %c12 = arith.constant 12 : index
    %c0_12 = arith.constant 0 : index
    %11 = vector.load %arg5[%c12, %c0_12] : memref<36x288xbf16, #tpu.memory_space<vmem>>, vector<4x288xbf16>
    tpu.vector_store %arg5[%c12, %c0_12], %10 {strides = array<i32>} : memref<36x288xbf16, #tpu.memory_space<vmem>>, vector<4x288xbf16>,
    %c0_13 = arith.constant 0 : index
    %c0_14 = arith.constant 0 : index
    %c19 = arith.constant 19 : index
    %12 = vector.load %arg1[%c0_13, %c0_14, %c19] : memref<1x4x326xbf16, #tpu.memory_space<vmem>>, vector<1x4x288xbf16>
    %13 = vector.shape_cast %12 : vector<1x4x288xbf16> to vector<4x288xbf16>
    %c16 = arith.constant 16 : index
    %c0_15 = arith.constant 0 : index
    %14 = vector.load %arg5[%c16, %c0_15] : memref<36x288xbf16, #tpu.memory_space<vmem>>, vector<4x288xbf16>
    tpu.vector_store %arg5[%c16, %c0_15], %13 {strides = array<i32>} : memref<36x288xbf16, #tpu.memory_space<vmem>>, vector<4x288xbf16>,
    %c0_16 = arith.constant 0 : index
    %c0_17 = arith.constant 0 : index
    %c20 = arith.constant 20 : index
    %15 = vector.load %arg1[%c0_16, %c0_17, %c20] : memref<1x4x326xbf16, #tpu.memory_space<vmem>>, vector<1x4x288xbf16>
    %16 = vector.shape_cast %15 : vector<1x4x288xbf16> to vector<4x288xbf16>
    %c20_18 = arith.constant 20 : index
    %c0_19 = arith.constant 0 : index
    %17 = vector.load %arg5[%c20_18, %c0_19] : memref<36x288xbf16, #tpu.memory_space<vmem>>, vector<4x288xbf16>
    tpu.vector_store %arg5[%c20_18, %c0_19], %16 {strides = array<i32>} : memref<36x288xbf16, #tpu.memory_space<vmem>>, vector<4x288xbf16>,
    %c0_20 = arith.constant 0 : index
    %c0_21 = arith.constant 0 : index
    %c36 = arith.constant 36 : index
    %18 = vector.load %arg1[%c0_20, %c0_21, %c36] : memref<1x4x326xbf16, #tpu.memory_space<vmem>>, vector<1x4x288xbf16>
    %19 = vector.shape_cast %18 : vector<1x4x288xbf16> to vector<4x288xbf16>
    %c24 = arith.constant 24 : index
    %c0_22 = arith.constant 0 : index
    %20 = vector.load %arg5[%c24, %c0_22] : memref<36x288xbf16, #tpu.memory_space<vmem>>, vector<4x288xbf16>
    tpu.vector_store %arg5[%c24, %c0_22], %19 {strides = array<i32>} : memref<36x288xbf16, #tpu.memory_space<vmem>>, vector<4x288xbf16>,
    %c0_23 = arith.constant 0 : index
    %c0_24 = arith.constant 0 : index
    %c37 = arith.constant 37 : index
    %21 = vector.load %arg1[%c0_23, %c0_24, %c37] : memref<1x4x326xbf16, #tpu.memory_space<vmem>>, vector<1x4x288xbf16>
    %22 = vector.shape_cast %21 : vector<1x4x288xbf16> to vector<4x288xbf16>
    %c28 = arith.constant 28 : index
    %c0_25 = arith.constant 0 : index
    %23 = vector.load %arg5[%c28, %c0_25] : memref<36x288xbf16, #tpu.memory_space<vmem>>, vector<4x288xbf16>
    tpu.vector_store %arg5[%c28, %c0_25], %22 {strides = array<i32>} : memref<36x288xbf16, #tpu.memory_space<vmem>>, vector<4x288xbf16>,
    %c0_26 = arith.constant 0 : index
    %c0_27 = arith.constant 0 : index
    %c38 = arith.constant 38 : index
    %24 = vector.load %arg1[%c0_26, %c0_27, %c38] : memref<1x4x326xbf16, #tpu.memory_space<vmem>>, vector<1x4x288xbf16>
    %25 = vector.shape_cast %24 : vector<1x4x288xbf16> to vector<4x288xbf16>
    %c32 = arith.constant 32 : index
    %c0_28 = arith.constant 0 : index
    %26 = vector.load %arg5[%c32, %c0_28] : memref<36x288xbf16, #tpu.memory_space<vmem>>, vector<4x288xbf16>
    tpu.vector_store %arg5[%c32, %c0_28], %25 {strides = array<i32>} : memref<36x288xbf16, #tpu.memory_space<vmem>>, vector<4x288xbf16>,
    %c0_29 = arith.constant 0 : index
    %c0_30 = arith.constant 0 : index
    %27 = vector.load %arg2[%c0_29, %c0_30] : memref<8x36xbf16, #tpu.memory_space<vmem>>, vector<8x36xbf16>
    %c0_31 = arith.constant 0 : index
    %c0_32 = arith.constant 0 : index
    %28 = vector.load %arg5[%c0_31, %c0_32] : memref<36x288xbf16, #tpu.memory_space<vmem>>, vector<36x288xbf16>
    %cst = arith.constant dense<0.000000e+00> : vector<8x288xf32>
    %29 = tpu.matmul %27, %28, %cst {dimension_numbers = #tpu.dot_dimension_numbers<[1], [0], [0], [1], [0, 0, 1, 1], [], []>} : vector<8x36xbf16>, vector<36x288xbf16>, vector<8x288xf32> -> vector<8x288xf32>
    %c0_33 = arith.constant 0 : index
    %c0_34 = arith.constant 0 : index
    %30 = vector.load %arg3[%c0_33, %c0_34] : memref<8x1xf32, #tpu.memory_space<vmem>>, vector<8x1xf32>
    %31 = vector.broadcast %30 : vector<8x1xf32> to vector<8x288xf32>
    %32 = arith.addf %29, %31 : vector<8x288xf32>
    %cst_35 = arith.constant 0.000000e+00 : f32
    %33 = vector.broadcast %cst_35 : f32 to vector<8x288xf32>
    %34 = arith.maximumf %32, %33 : vector<8x288xf32>
    %35 = vector.shape_cast %34 : vector<8x288xf32> to vector<1x8x288xf32>
    %36 = arith.truncf %35 : vector<1x8x288xf32> to vector<1x8x288xbf16>
    %c0_36 = arith.constant 0 : index
    %c0_37 = arith.constant 0 : index
    %c0_38 = arith.constant 0 : index
    %37 = vector.load %arg4[%c0_36, %c0_37, %c0_38] : memref<1x8x288xbf16, #tpu.memory_space<vmem>>, vector<1x8x288xbf16>
    tpu.vector_store %arg4[%c0_36, %c0_37, %c0_38], %36 {strides = array<i32>} : memref<1x8x288xbf16, #tpu.memory_space<vmem>>, vector<1x8x288xbf16>,
    return
  }
  func.func @transform_0(%arg0: i32) -> (i32, i32, i32) {
    %c0_i32 = arith.constant 0 : i32
    %c0_i32_0 = arith.constant 0 : i32
    %c0_i32_1 = arith.constant 0 : i32
    return %arg0, %c0_i32, %c0_i32_0 : i32, i32, i32
  }
  func.func @transform_1(%arg0: i32) -> (i32, i32) {
    %c0_i32 = arith.constant 0 : i32
    %c0_i32_0 = arith.constant 0 : i32
    %c0_i32_1 = arith.constant 0 : i32
    return %c0_i32, %c0_i32_0 : i32, i32
  }
  func.func @transform_2(%arg0: i32) -> (i32, i32) {
    %c0_i32 = arith.constant 0 : i32
    %c0_i32_0 = arith.constant 0 : i32
    %c0_i32_1 = arith.constant 0 : i32
    return %c0_i32, %c0_i32_0 : i32, i32
  }
  func.func @transform_3(%arg0: i32) -> (i32, i32, i32) {
    %c0_i32 = arith.constant 0 : i32
    %c0_i32_0 = arith.constant 0 : i32
    %c0_i32_1 = arith.constant 0 : i32
    return %arg0, %c0_i32, %c0_i32_0 : i32, i32, i32
  }
}

</mosaic_0001>

<bundles_post_ra>
// kernel: tpu_custom_call.1
= control target key start
LH: loop header
LB: loop body
LE: loop exit
PB: predicated region body
PF: predicated region fallthrough
CT: control target
= control target key end

     0   :  { %8 = vsyncpa [#allocation4], 0  ;;  %s1149_s0 = inlined_call_operand.hbm [shape: bf16[2,4,326], index: 0, kind: input, shape index: {}]   ;;  %s1150_s1 = inlined_call_operand.vmem [shape: bf16[8,36], index: 1, kind: input, shape index: {}]   ;;  %s1151_s2 = inlined_call_operand.vmem [shape: f32[8,1], index: 2, kind: input, shape index: {}]   ;;  %s1152_s3 = inlined_call_operand.hbm [shape: bf16[2,8,288], index: 3, kind: output, shape index: {}]  }
   0x1   :  { %10 = vsyncpa [#allocation4 + $0x1], 0 }
   0x2   :  { %11 = vsyncpa [#allocation5], 0 }
   0x3   :  { %13 = vsyncpa [#allocation5 + $0x1], 0  ;;  %s959_s12 = smov 0   ;;  %s961_s13 = smov 0  }
   0x4   :  { %s963_s14 = smov 0   ;;  %s965_s15 = smov 0  }
   0x5 LB: > { %s980_s16 = sadd.s32 4294967295, %s923_s15   ;;  %s708_s17 = sadd.s32 4294967294, %s923_s15   ;;  %s923_s15 = sphi %s965_s15, %s1168_s15   ;;  %s919_s14 = sphi %s963_s14, %s1167_s14   ;;  %s915_s13 = sphi %s961_s13, %s1166_s13   ;;  %s911_s12 = sphi %s959_s12, %s1165_s12  }
   0x6   : > { %s984_s18 = sadd.s32 1, %s923_s15   ;;  %s26_s19 = sadd.s32 1, %s919_s14 }
   0x7   : > { %s23_s20 = ssub.s32 %s923_s15, %s984_s18  ;;  %p33_p0 = scmp.ne.s32.totalorder %s919_s14, %s915_s13 }
   0x8   : > { %p24_p1 = scmp.eq.s32.totalorder %s23_s20, 0  ;;  %p34_p2 = scmp.eq.s32.totalorder %s923_s15, 0 }
   0x9   : > { %p39_p3 = scmp.ne.s32.totalorder %s915_s13, %s911_s12  ;;  %p40_p4 = scmp.eq.s32.totalorder %s980_s16, 0 }
   0xa   : > { %s996_s21 = scalar_select %p24_p1, %s919_s14, %s26_s19  }
   0xb   : > { %p35_p5 = por %p34_p2, %p33_p0  ;;  %p998_p6 = por %p40_p4, %p39_p3 }
   0xc   : > { %p105_p7 = scmp.eq.s32.totalorder %s980_s16, 1  ;;  %p111_p8 = scmp.eq.s32.totalorder %s708_s17, 1 }
   0xd   : > { %s1155_s22 = scalar_select %p998_p6, 1, 0 }
   0xe   : > { %p764_p10 = scmp.lt.s32.totalorder %s923_s15, 2  ;;  %p1005_p11 = por %p105_p7, %p33_p0 }
   0xf   : > { %p1009_p12 = por %p111_p8, %p39_p3  ;;  %s137_s25 = sand.u32 1, %s919_s14  }
  0x10   : > { %s1156_s23 = scalar_select %p1005_p11, 1, 0 }
  0x11   : > { %s1157_s24 = scalar_select %p1009_p12, 1, 0 }
  0x12   : > { %s748_s26 = smul.u32 96, %s923_s15  ;;  %p1020_p13 = pnand %p764_p10, %p35_p5 }
  0x13   : > { %s747_s27 = smul.u32 6, %s137_s25  ;;  %s138_s7 = scalar_lea.sflag [#allocation4], %s137_s25 }
  0x14   : > { %s1018_s30 = scalar_lea.hbm %s1149_s0, %s748_s26  ;;  %p833_p3 = pneg %p1020_p13 }
  0x15   : > { %s141_s5 = scalar_lea.vmem [#allocation3], %s747_s27  ;;  %s831_s8 = scalar_lea.hbm %s1018_s30, 96 }
  0x16   : > { %s149_s6 = sshll.u32 %s141_s5, 4  ;;  %p832_p2 = scmp.ne.s32.totalorder %s1018_s30, %s831_s8  ;;  %s150_s6 = int_to_ptr.vmem [resolvable:$true] %s149_s6 }
  0x17   : > { %s836_s11 = scalar_lea.hbm %s1149_s0, 192  ;;  %p837_p5 = scmp.lt.s32.totalorder %s1018_s30, %s1149_s0 }
  0x18   : > { %p834_p4 = pnand %p833_p3, %p832_p2  ;;  %p838_p8 = scmp.lt.s32.totalorder %s836_s11, %s831_s8 }
  0x1a   : > { %p835_p7 = pneg %p834_p4  ;;  %p839_p10 = por %p838_p8, %p837_p5 }
  0x1c   : > { %p840_p9 = pnand %p839_p10, %p835_p7 }
  0x1e   : > { %843 = shalt.err (!%p840_p9)
}
  0x1f   : > { %s844_s20 = scalar_lea.vmem %s150_s6, 96  ;;  %s925_s25 = smov [#allocation3]  }
  0x20   : > { %p845_p0 = scmp.ne.s32.totalorder %s150_s6, %s844_s20  ;;  %s849_s26 = sshll.u32 %s925_s25, 4  ;;  %s850_s26 = int_to_ptr.vmem [resolvable:$false] %s849_s26 }
  0x21   : > { %s851_s27 = scalar_lea.vmem %s850_s26, 192  ;;  %p852_p2 = scmp.lt.s32.totalorder %s150_s6, %s850_s26 }
  0x22   : > { %p847_p1 = pnand %p845_p0, %p833_p3  ;;  %p853_p4 = scmp.lt.s32.totalorder %s851_s27, %s844_s20 }
  0x24   : > { %p848_p12 = pneg %p847_p1  ;;  %p854_p11 = por %p853_p4, %p852_p2 }
  0x26   : > { %p855_p6 = pnand %p854_p11, %p848_p12 }
  0x28   : > { %858 = shalt.err (!%p855_p6)
}
  0x29   : > { %759 = dma.hbm_to_vmem [thread:$0]  (!%p1020_p13), %s1018_s30, 96, %s150_s6, %s138_s7  }
  0x2a   : > { %p1159_p9 = scmp.lt.s32.totalorder %s923_s15, 3  ;;  %p1160_p7 = scmp.ge.s32.totalorder %s923_s15, 1 }
  0x2c   : > { %p155_p5 = pnand %p1160_p7, %p1159_p9 }
  0x2d   : > { %s1045_s28 = sand.u32 (!%p155_p5), 1, %s915_s13   ;;  %p1161_p6 = scmp.ne.s32.totalorder (!%p155_p5), %s1155_s22, 0 }
  0x2e   : > { %158 = sbr.rel (%p155_p5) target bundleno = 434 (0x1b2), region = 32  ;;  %s161_s5 = scalar_lea.sflag (!%p155_p5), [#allocation4], %s1045_s28 }
  0x2f   : > { %s749_s29 = smul.u32 (!%p155_p5), 6, %s1045_s28 }
  0x31   : > { %s1049_s8 = scalar_lea.vmem (!%p155_p5), [#allocation3], %s749_s29 }
  0x33   : > { %902 = dma.done.wait (%p1161_p6), %s161_s5, 96  }
  0x34   : > { %904 = vsyncadd (%p1161_p6), %s161_s5, 4294967200  ;;  %v201_v0 = vlaneseq  ;;  %v926_v1 = vmov 1983009808   ;;  %v422_v6 = vld [vmem:[%s1049_s8] sm:$0x3f]  ;;  %s927_s22 = smov 90  }
  0x35   : > { %v199_v2 = vunpack.c.l.s4 %v926_v1  ;;  %v302_v7 = vld [vmem:[%s1049_s8] sm:$0x3f]  ;;  %v424_v12 = vcombine.high %v422_v6, %v422_v6  ;;  %s928_s30 = smov 109   ;;  %s929_s4 = smov 92   ;;  %vm208_vm0 = vcmask 254976   ;;  %v931_v24 = vmov 0.0  }
  0x36   : > { %v202_v3 = vshrl.u32 %v201_v0, 7  ;;  %v362_v8 = vld [vmem:[%s1049_s8] sm:$0x3f]  ;;  %v304_v14 = vcombine.high %v302_v7, %v302_v7  ;;  %s930_s6 = smov 108   ;;  %737 = vmatprep.subr.bf16.mxu1 %v931_v24  ;;  %s932_s7 = smov 91   ;;  %vm935_vm1 = vmmov 0  }
  0x37   : > { %v200_v4 = vunpack.c.0.s8 %v199_v2  ;;  %v332_v11 = vld [vmem:[%s1049_s8] sm:$0x3f]  ;;  %v364_v21 = vcombine.high %v362_v8, %v362_v8  ;;  %s933_s9 = smov 127   ;;  %s934_s10 = smov 126   ;;  %743 = vmatprep.mubr.msk.bf16.mxu1 %vm935_vm1, %v931_v24  ;;  %v937_v42 = vmov 0   ;;  %vm240_vm2 = vcmask 257026  }
  0x38   : > { %v188_v13 = vld [vmem:[%s1049_s8] sm:$0x3f]  ;;  %v334_v17 = vcombine.low %v332_v11, %v332_v11  ;;  %s936_s11 = smov 110   ;;  %555 = vmatprep.mubr.bf16.mxu0 %v937_v42  ;;  %810 = vset.pattern.permute.xlu0 %v937_v42  ;;  %vm233_vm3 = vcmask 1043456   ;;  %vm446_vm4 = vcmask 736256   ;;  %vm326_vm5 = vcmask 891904  }
  0x39   : > { %v1055_v5 = vsub.s32 %v200_v4, %v202_v3  ;;  %713 = vst.sshfl [vmem:[#allocation2] sm:$0xf pattern:$0x76325410] %v188_v13  ;;  %v190_v18 = vcombine.high %v188_v13, %v188_v13  ;;  %v392_v22 = vld [vmem:[%s1049_s8] sm:$0x3f] }
  0x3a   : > { %v394_v27 = vcombine.low %v392_v22, %v392_v22  ;;  %v210_v28 = vld [vmem:[%s1049_s8] sm:$0x3f]  ;;  %vm356_vm6 = vcmask 883712   ;;  %vm386_vm7 = vcmask 752640   ;;  %vm513_vm8 = vcmask 1041408   ;;  %s750_s26 = smul.u32 12, %s1045_s28 }
  0x3b   : > { %v431_v9 = vrot.slane %v422_v6, %v1055_v5  ;;  %v311_v10 = vrot.slane %v302_v7, %v1055_v5  ;;  %v371_v15 = vrot.slane %v362_v8, %v1055_v5  ;;  %v348_v16 = vrot.slane %v332_v11, %v1055_v5  ;;  %v242_v32 = vld [vmem:[%s1049_s8] sm:$0x3f]  ;;  %s751_s29 = smul.u32 192, %s980_s16  ;;  %p1162_p12 = scmp.ne.s32.totalorder %s1156_s23, 0 }
  0x3c   : > { %v438_v19 = vrot.slane %v424_v12, %v1055_v5  ;;  %v318_v20 = vrot.slane %v304_v14, %v1055_v5  ;;  %v204_v23 = vrot.slane %v190_v18, %v1055_v5  ;;  %v341_v25 = vrot.slane %v334_v17, %v1055_v5  ;;  %v272_v36 = vld [vmem:[%s1049_s8] sm:$0x3f]  ;;  %s186_s27 = scalar_lea.vmem [#allocation6], %s750_s26 }
  0x3d   : > { %439 = vrot.lane.b32.xlu0 %v431_v9, %s927_s22  ;;  %319 = vrot.lane.b32.xlu1 %v311_v10, %s928_s30  ;;  %v378_v26 = vrot.slane %v364_v21, %v1055_v5  ;;  %v401_v29 = vrot.slane %v394_v27, %v1055_v5  ;;  %v408_v30 = vrot.slane %v392_v22, %v1055_v5  ;;  %v463_v43 = vld [vmem:[%s1151_s2] sm:$0xff]  ;;  %vm416_vm9 = vcmask 744448   ;;  %s638_s5 = sshll.u32 %s186_s27, 4  ;;  %s639_s5 = int_to_ptr.vmem [resolvable:$true] %s638_s5 }
  0x3e   : > { %209 = vst.msk [vmem:[#allocation2 + $0x8] sm:$0x3] %vm208_vm0, %v204_v23  ;;  %v212_v31 = vcombine.low %v210_v28, %v210_v28  ;;  %v226_v33 = vrot.slane %v210_v28, %v1055_v5  ;;  %v244_v35 = vcombine.high %v242_v32, %v242_v32  ;;  %v251_v38 = vrot.slane %v242_v32, %v1055_v5 }
  0x3f   : > { %v274_v39 = vcombine.low %v272_v36, %v272_v36  ;;  %v288_v40 = vrot.slane %v272_v36, %v1055_v5  ;;  %vm235_vm10 = vcmask 1039360   ;;  %vm266_vm11 = vcmask 1031168  }
  0x40   : > { %v219_v34 = vrot.slane %v212_v31, %v1055_v5  ;;  %v258_v37 = vrot.slane %v244_v35, %v1055_v5  ;;  %vm296_vm12 = vcmask 900096   ;;  %vm509_vm13 = vcmask 293888  }
  0x41   : > { %379 = vrot.lane.b32.xlu0 %v371_v15, %s929_s4  ;;  %351 = vrot.lane.b32.xlu1 %v348_v16, %s930_s6  ;;  %v281_v41 = vrot.slane %v274_v39, %v1055_v5  ;;  %vm621_vm14 = vcmask 257024  }
  0x45   : > { %441 = vrot.lane.b32.xlu0 %v438_v19, %s927_s22  ;;  %321 = vrot.lane.b32.xlu1 %v318_v20, %s928_s30  ;;  %s636_s30 = scalar_lea.hbm %s1152_s3, %s751_s29 }
  0x49   : > { %349 = vrot.lane.b32.xlu0 %v341_v25, %s930_s6  ;;  %381 = vrot.lane.b32.xlu1 %v378_v26, %s929_s4  ;;  %s624_s4 = scalar_lea.sflag [#allocation5], %s1045_s28  ;;  %s859_s6 = scalar_lea.vmem %s639_s5, 192 }
  0x4a   : > { %p860_p11 = scmp.ne.s32.totalorder %s639_s5, %s859_s6 }
  0x4c   : > { %p861_p13 = pnand %p860_p11, %p1162_p12 }
  0x4d   : > { %409 = vrot.lane.b32.xlu0 %v401_v29, %s932_s7  ;;  %411 = vrot.lane.b32.xlu1 %v408_v30, %s932_s7  ;;  %s938_s7 = smov [#allocation6]  }
  0x4e   : > { %p862_p0 = pneg %p861_p13  ;;  %s863_s16 = sshll.u32 %s938_s7, 4  ;;  %s864_s16 = int_to_ptr.vmem [resolvable:$false] %s863_s16 }
  0x4f   : > { %p866_p1 = scmp.lt.s32.totalorder %s639_s5, %s864_s16 }
  0x51   : > { %229 = vrot.lane.b32.xlu1 %v226_v33, %s933_s9  ;;  %227 = vrot.lane.b32.xlu0 %v219_v34, %s933_s9  ;;  %s865_s9 = scalar_lea.vmem %s864_s16, 384 }
  0x52   : > { %p867_p3 = scmp.lt.s32.totalorder %s865_s9, %s859_s6 }
  0x54   : > { %p868_p8 = por %p867_p3, %p866_p1 }
  0x55   : > { %261 = vrot.lane.b32.xlu1 %v258_v37, %s934_s10  ;;  %259 = vrot.lane.b32.xlu0 %v251_v38, %s934_s10 }
  0x56   : > { %p869_p10 = pnand %p868_p8, %p862_p0 }
  0x59   : > { %291 = vrot.lane.b32.xlu1 %v288_v40, %s936_s11  ;;  %289 = vrot.lane.b32.xlu0 %v281_v41, %s936_s11 }
  0x5d   : > { %466 = vperm.xlu0 %810, %v463_v43  }
  0xaf   : > { %v440_v44 = vpop.permute.xlu0 %439  ;;  %v320_v45 = vpop.permute.xlu1 %319 }
  0xb0   : > { %v443_v50 = vrot.slane %v440_v44, 4  ;;  %v323_v51 = vrot.slane %v320_v45, 4 }
  0xb3   : > { %v380_v46 = vpop.permute.xlu0 %379  ;;  %v352_v47 = vpop.permute.xlu1 %351 }
  0xb4   : > { %361 = vst.msk [vmem:[#allocation2 + $0x20] sm:$0xc] %vm240_vm2, %v352_v47  ;;  %v383_v60 = vrot.slane %v380_v46, 4  ;;  %v354_v61 = vrot.slane %v352_v47, 4 }
  0xb7   : > { %v442_v48 = vpop.permute.xlu0 %441  ;;  %v322_v49 = vpop.permute.xlu1 %321 }
  0xb8   : > { %v444_v52 = vrot.slane %v442_v48, 4  ;;  %451 = vst.msk [vmem:[#allocation2 + $0x38] sm:$0x3] %vm208_vm0, %v442_v48  ;;  %v324_v53 = vrot.slane %v322_v49, 4  ;;  %331 = vst.msk [vmem:[#allocation2 + $0x20] sm:$0x3] %vm208_vm0, %v322_v49 }
  0xba   : > { %v445_v54 = vsel %vm233_vm3, %v443_v50, %v444_v52  ;;  %v325_v55 = vsel %vm233_vm3, %v323_v51, %v324_v53 }
  0xbb   : > { %v447_v56 = vsel %vm446_vm4, %v440_v44, %v445_v54  ;;  %v327_v57 = vsel %vm326_vm5, %v320_v45, %v325_v55  ;;  %v350_v58 = vpop.permute.xlu0 %349  ;;  %v382_v59 = vpop.permute.xlu1 %381 }
  0xbc   : > { %450 = vst [vmem:[#allocation2 + $0x30] sm:$0x33] %v447_v56  ;;  %330 = vst [vmem:[#allocation2 + $0x18] sm:$0x33] %v327_v57  ;;  %v353_v62 = vrot.slane %v350_v58, 4  ;;  %v384_v63 = vrot.slane %v382_v59, 4 }
  0xbd   : > { %391 = vst.msk [vmem:[#allocation2 + $0x2c] sm:$0x3] %vm208_vm0, %v382_v59 }
  0xbe   : > { %v355_v0 = vsel %vm233_vm3, %v353_v62, %v354_v61  ;;  %v385_v1 = vsel %vm233_vm3, %v383_v60, %v384_v63 }
  0xbf   : > { %v357_v2 = vsel %vm356_vm6, %v350_v58, %v355_v0  ;;  %v387_v3 = vsel %vm386_vm7, %v380_v46, %v385_v1  ;;  %v410_v4 = vpop.permute.xlu0 %409  ;;  %v412_v5 = vpop.permute.xlu1 %411  ;;  %v820_v6 = vld [vmem:[#allocation2 + $0x38] ss:$0 sps:$4 sm:$0x33]  }
  0xc0   : > { %360 = vst [vmem:[#allocation2 + $0x18] sm:$0xcc] %v357_v2  ;;  %390 = vst [vmem:[#allocation2 + $0x24] sm:$0x33] %v387_v3  ;;  %v413_v7 = vrot.slane %v410_v4, 4  ;;  %v414_v8 = vrot.slane %v412_v5, 4 }
  0xc1   : > { %421 = vst.msk [vmem:[#allocation2 + $0x2c] sm:$0xc] %vm240_vm2, %v412_v5  ;;  %v521_v9 = vsel %vm513_vm8, %v820_v6, 0 }
  0xc2   : > { %v415_v10 = vsel %vm233_vm3, %v413_v7, %v414_v8  ;;  %738 = vmatpush3.bf16.msra.mxu1 %v521_v9 }
  0xc3   : > { %v417_v11 = vsel %vm416_vm9, %v410_v4, %v415_v10  ;;  %v230_v12 = vpop.permute.xlu1 %229  ;;  %v228_v13 = vpop.permute.xlu0 %227  ;;  %v461_v14 = vld [vmem:[#allocation2 + $0x30] sm:$0x33]  ;;  %739 = vmatprep.subr.bf16.mxu1 %v931_v24 }
  0xc4   : > { %420 = vst [vmem:[#allocation2 + $0x24] sm:$0xcc] %v417_v11  ;;  %v232_v15 = vrot.slane %v230_v12, 4  ;;  %241 = vst.msk [vmem:[#allocation2 + $0x8] sm:$0xc] %vm240_vm2, %v230_v12  ;;  %v231_v16 = vrot.slane %v228_v13, 4  ;;  %v721_v17 = vcombine.high %v461_v14, %v461_v14  ;;  %v720_v18 = vcombine.low %v461_v14, %v461_v14 }
  0xc6   : > { %v234_v19 = vsel %vm233_vm3, %v231_v16, %v232_v15  ;;  %723 = vmatprep.subr.msk.bf16.mxu0 %vm513_vm8, %v721_v17  ;;  %v515_v20 = vsel %vm513_vm8, %v720_v18, 0 }
  0xc7   : > { %v236_v21 = vsel %vm235_vm10, %v228_v13, %v234_v19  ;;  %534 = vmatpush1.bf16.msra.mxu0 %v515_v20  ;;  %v262_v22 = vpop.permute.xlu1 %261  ;;  %v260_v23 = vpop.permute.xlu0 %259 }
  0xc8   : > { %v823_v25 = vld [vmem:[#allocation2 + $0x20] ss:$12 sps:$4 sm:$0xff]   ;;  %239 = vst [vmem:[#allocation2] sm:$0xcc] %v236_v21  ;;  %v264_v26 = vrot.slane %v262_v22, 4  ;;  %v263_v27 = vrot.slane %v260_v23, 4 }
  0xc9   : > { %271 = vst.msk [vmem:[#allocation2 + $0x14] sm:$0x3] %vm208_vm0, %v262_v22  ;;  %740 = vmatpush3.bf16.msra.mxu1 %v823_v25 }
  0xca   : > { %v265_v28 = vsel %vm233_vm3, %v263_v27, %v264_v26  ;;  %741 = vmatprep.subr.bf16.mxu1 %v931_v24  ;;  %v452_v24 = vld [vmem:[%s1150_s1] sm:$0xf] }
  0xcb   : > { %v267_v29 = vsel %vm266_vm11, %v260_v23, %v265_v28  ;;  %v292_v30 = vpop.permute.xlu1 %291  ;;  %v290_v31 = vpop.permute.xlu0 %289  ;;  %v824_v32 = vld [vmem:[#allocation2 + $0x1c] ss:$12 sps:$4 sm:$0xff]   ;;  %v826_v33 = vld [vmem:[#allocation2 + $0x18] ss:$12 sps:$4 sm:$0xff]  }
  0xcc   : > { %270 = vst [vmem:[#allocation2 + $0xc] sm:$0x33] %v267_v29  ;;  %v294_v34 = vrot.slane %v292_v30, 4  ;;  %301 = vst.msk [vmem:[#allocation2 + $0x14] sm:$0xc] %vm240_vm2, %v292_v30  ;;  %v293_v35 = vrot.slane %v290_v31, 4  ;;  %535 = vmatprep.subr.bf16.mxu0 %v824_v32 }
  0xcd   : > { %536 = vmatpush1.bf16.msra.mxu0 %v826_v33 }
  0xce   : > { %v295_v36 = vsel %vm233_vm3, %v293_v35, %v294_v34 }
  0xcf   : > { %v297_v37 = vsel %vm296_vm12, %v290_v31, %v295_v36 }
  0xd0   : > { %300 = vst [vmem:[#allocation2 + $0xc] sm:$0xcc] %v297_v37 }
  0xd3   : > { %v827_v38 = vld [vmem:[#allocation2 + $0x8] ss:$12 sps:$4 sm:$0xff]  }
  0xd4   : > { %742 = vmatpush3.bf16.msra.mxu1 %v827_v38 }
  0xd7   : > { %v828_v39 = vld [vmem:[#allocation2 + $0x4] ss:$12 sps:$4 sm:$0xff]   ;;  %v830_v40 = vld [vmem:[#allocation2] ss:$12 sps:$4 sm:$0xff]   ;;  %744 = vmatmul.mubr.msk.bf16.vlgmr.msra.gmra.mxu1 %vm509_vm13, %v452_v24 }
  0xd8   : > { %537 = vmatprep.subr.bf16.mxu0 %v828_v39  ;;  %v467_v42 = vpop.permute.xlu0 %466 }
  0xd9   : > { %538 = vmatpush1.bf16.msra.mxu0 %v830_v40 }
  0xdc   : > { %724 = vmatmul.mubr.msk.bf16.vlgmr.msra.gmra.mxu0 %vm509_vm13, %v452_v24 }
 0x197   : > { %v598_v41 = vpop.f32.mrf.mxu1 }
 0x198   : > { %v599_v43 = vadd.f32 %v598_v41, %v467_v42 }
 0x199   : > { %v745_v44 = vpop.f32.mrf.mxu1 }
 0x19a   : > { %v606_v45 = vmax.f32 %v599_v43, 0.0 }
 0x19b   : > { %v601_v46 = vpop.f32.mrf.mxu1 }
 0x19c   : > { %v732_v47 = vpack.c.bf16 %v606_v45, %v606_v45  ;;  %v557_v48 = vpop.f32.mrf.mxu0 }
 0x19d   : > { %v558_v49 = vadd.f32 %v557_v48, %v467_v42  ;;  %v746_v50 = vpop.f32.mrf.mxu1 }
 0x19e   : > { %v559_v51 = vpop.f32.mrf.mxu0  ;;  %622 = vst.msk [vmem:[%s186_s27 + $0x8] sm:$0xf] %vm621_vm14, %v732_v47 }
 0x19f   : > { %v560_v52 = vadd.f32 %v559_v51, %v467_v42  ;;  %v604_v54 = vmax.f32 %v558_v49, 0.0 }
 0x1a0   : > { %v561_v53 = vpop.f32.mrf.mxu0 }
 0x1a1   : > { %v605_v55 = vmax.f32 %v560_v52, 0.0 }
 0x1a2   : > { %v562_v56 = vpop.f32.mrf.mxu0 }
 0x1a3   : > { %v731_v57 = vpack.c.bf16 %v605_v55, %v604_v54 }
 0x1a5   : > { %620 = vst [vmem:[%s186_s27] sm:$0xff] %v731_v57 }
 0x1a6   : > { %872 = shalt.err (!%p869_p10)
}
 0x1a7   : > { %s873_s10 = scalar_lea.hbm %s636_s30, 192  ;;  %s877_s17 = scalar_lea.hbm %s1152_s3, 384 }
 0x1a8   : > { %p874_p2 = scmp.ne.s32.totalorder %s636_s30, %s873_s10  ;;  %p878_p7 = scmp.lt.s32.totalorder %s636_s30, %s1152_s3 }
 0x1a9   : > { %p879_p5 = scmp.lt.s32.totalorder %s877_s17, %s873_s10 }
 0x1aa   : > { %p875_p4 = pnand %p874_p2, %p1162_p12 }
 0x1ab   : > { %p880_p6 = por %p879_p5, %p878_p7 }
 0x1ac   : > { %p876_p9 = pneg %p875_p4 }
 0x1ae   : > { %p881_p11 = pnand %p880_p6, %p876_p9 }
 0x1b0   : > { %884 = shalt.err (!%p881_p11)
}
 0x1b1   : > { %754 = dma.vmem_to_hbm [thread:$0]  (%p1162_p12), %s639_s5, 192, %s636_s30, %s624_s4  }
 0x1b2 PF: > { %s650_s25 = sand.u32 1, %s911_s12   ;;  %p1163_p13 = scmp.ne.s32.totalorder %s1157_s24, 0 }
 0x1b3   : > { %p1164_p0 = scmp.ge.s32.totalorder %s923_s15, 2  ;;  %s651_s26 = scalar_lea.sflag [#allocation5], %s650_s25 }
 0x1b5   : > { %p761_p1 = pnand %p1164_p0, %p1163_p13 }
 0x1b7   : > { %p762_p3 = pneg %p761_p1 }
 0x1b9   : > { %906 = dma.done.wait (%p762_p3), %s651_s26, 192  }
 0x1ba   : > { %908 = vsyncadd (%p762_p3), %s651_s26, 4294967104  ;;  %p16_p8 = scmp.ge.s32.totalorder %s984_s18, 4   ;;  %s1165_s12 = smov %s915_s13 }
 0x1bb   : > { %s1166_s13 = smov %s919_s14  ;;  %s1167_s14 = smov %s996_s21 }
 0x1bc   : > { %s1168_s15 = smov %s984_s18  ;;  %18 = sbr.rel (!%p16_p8) target bundleno = 5 (0x5), region = 77 }
 0x1c1   :  { %656 = vsyncpa [#allocation4], 1 }
 0x1c2   :  { %658 = vsyncpa [#allocation4 + $0x1], 1 }
 0x1c3   :  { %659 = vsyncpa [#allocation5], 1 }
 0x1c4   :  { %661 = vsyncpa [#allocation5 + $0x1], 1 }

</bundles_post_ra>
